<compile_context>
chip_gen: v7x
topology: tpu7x:2x2x1
jax: 0.10.0
libtpu: 0.0.40
codegen_flags: <defaults>
</compile_context>

<pallas_src>
import jax
import jax.numpy as jnp
from jax.experimental import pallas as pl
from jax.experimental.pallas import tpu as pltpu


def rawnet_kernel(x_ref, w1_ref, b1_ref, w2_ref, b2_ref, w3_ref, b3_ref, o_ref):
    """Fused 3-layer MLP forward on one feature-major batch tile.

    x_ref : (2, TN)       w1_ref: (H, 2)    b1_ref: (H, 1)
    w2_ref: (H, H)        b2_ref: (H, 1)
    w3_ref: (1, H)        b3_ref: (1, 1)
    o_ref : (1, TN)
    """
    x0 = x_ref[0:1, :]  # (1, TN)
    x1 = x_ref[1:2, :]  # (1, TN)

    # Layer 1 (K=2): VPU broadcast multiply-adds, skip the MXU entirely.
    h1 = jnp.tanh(
        w1_ref[:, 0:1] * x0 + w1_ref[:, 1:2] * x1 + b1_ref[...]
    )  # (H, TN)

    # Layer 2 (H x H): the only matmul that deserves the MXU.
    h2 = jnp.tanh(
        jnp.dot(w2_ref[...], h1, preferred_element_type=jnp.float32) + b2_ref[...]
    )  # (H, TN)

    # Layer 3 ((1,H) @ (H,TN)): streams a wide N through the MXU; output is
    # naturally lane-dense.
    z = jnp.dot(w3_ref[...], h2, preferred_element_type=jnp.float32) + b3_ref[...]
    o_ref[...] = jax.nn.sigmoid(z)  # (1, TN)


def _round_up(a, b):
    return pl.cdiv(a, b) * b


def rawnet_forward(x, params, *, tile_n=2048):
    """x: (N, 2) f32.  params: PyTorch-layout weights (out,in), biases (out,1).

    Returns (N, 1) f32, matching RawNet.forward.
    """
    n, in_dim = x.shape
    assert in_dim == 2
    h = params["w1"].shape[0]

    # Lane-dense tiles: tile_n must be a multiple of 128; don't over-pad tiny
    # batches with a huge tile.
    tile_n = max(128, min(_round_up(tile_n, 128), _round_up(n, 128)))
    n_pad = _round_up(n, tile_n)

    # Feature-major: batch on the lane axis.  Pad ragged batch with zeros
    # (padded columns compute garbage that is sliced off below).
    xt = x.T  # (2, n)
    if n_pad != n:
        xt = jnp.pad(xt, ((0, 0), (0, n_pad - n)))

    grid = (n_pad // tile_n,)

    in_specs = [
        pl.BlockSpec((2, tile_n), lambda i: (0, i)),  # x (feature-major tile)
        pl.BlockSpec((h, 2), lambda i: (0, 0)),       # w1  (resident)
        pl.BlockSpec((h, 1), lambda i: (0, 0)),       # b1
        pl.BlockSpec((h, h), lambda i: (0, 0)),       # w2
        pl.BlockSpec((h, 1), lambda i: (0, 0)),       # b2
        pl.BlockSpec((1, h), lambda i: (0, 0)),       # w3
        pl.BlockSpec((1, 1), lambda i: (0, 0)),       # b3
    ]
    out_specs = pl.BlockSpec((1, tile_n), lambda i: (0, i))  # lane-dense output

    param_bytes = sum(int(v.size) * 4 for v in params.values())
    cost = pl.CostEstimate(
        flops=int(n_pad) * (2 * 2 * h + 2 * h * h + 2 * h),
        transcendentals=int(n_pad) * (2 * h + 1),
        bytes_accessed=int(n_pad) * (2 + 1) * 4 + param_bytes,
    )

    out = pl.pallas_call(
        rawnet_kernel,
        out_shape=jax.ShapeDtypeStruct((1, n_pad), jnp.float32),
        grid_spec=pltpu.PrefetchScalarGridSpec(
            num_scalar_prefetch=0,
            grid=grid,
            in_specs=in_specs,
            out_specs=out_specs,
        ),
        compiler_params=pltpu.CompilerParams(
            dimension_semantics=("parallel",),  # megacore: shard batch tiles over TCs
        ),
        cost_estimate=cost,
    )(
        xt,
        params["w1"], params["b1"],
        params["w2"], params["b2"],
        params["w3"], params["b3"],
    )  # (1, n_pad)

    return out[0, :n].reshape(n, 1)


def init_params(key, num_hid):
    """Deterministic init mimicking nn.Linear's U(-1/sqrt(fan_in), 1/sqrt(fan_in)).

    Weights in PyTorch layout (out_features, in_features); biases (out, 1)."""
    k1, k2, k3, k4, k5, k6 = jax.random.split(key, 6)

    def uniform(k, shape, fan_in):
        bound = 1.0 / jnp.sqrt(jnp.float32(fan_in))
        return jax.random.uniform(k, shape, jnp.float32, -bound, bound)

    return {
        "w1": uniform(k1, (num_hid, 2), 2),
        "b1": uniform(k2, (num_hid, 1), 2),
        "w2": uniform(k3, (num_hid, num_hid), num_hid),
        "b2": uniform(k4, (num_hid, 1), num_hid),
        "w3": uniform(k5, (1, num_hid), num_hid),
        "b3": uniform(k6, (1, 1), num_hid),
    }


def rawnet_reference(x, params):
    """Pure-JAX reference (matches PyTorch RawNet.forward semantics)."""
    h1 = jnp.tanh(x @ params["w1"].T + params["b1"].T)
    h2 = jnp.tanh(h1 @ params["w2"].T + params["b2"].T)
    return jax.nn.sigmoid(h2 @ params["w3"].T + params["b3"].T)


# TODO(synk): the PyTorch module also stashes self.hid1 / self.hid2 as
# attributes (a training-time side effect); only the forward output is
# reproduced here.

if __name__ == "__main__":
    key = jax.random.PRNGKey(0)
    k_param, k_x = jax.random.split(key)

    num_hid = 32
    batch = 300  # deliberately ragged: exercises padding + a 3-step grid

    params = init_params(k_param, num_hid)
    x = jax.random.normal(k_x, (batch, 2), dtype=jnp.float32)

    out = rawnet_forward(x, params, tile_n=128)
    out = jax.block_until_ready(out)

    ref = rawnet_reference(x, params)
    assert out.shape == (batch, 1)
    assert jnp.allclose(out, ref, atol=1e-5, rtol=1e-5), "mismatch vs reference"

    print("KERNEL_OK")
</pallas_src>

<mosaic_0001>
module attributes {stable_mosaic.version = 11 : i64} {
  func.func @rawnet_kernel(%arg0: i32, %arg1: memref<2x128xf32, #tpu.memory_space<vmem>>, %arg2: memref<32x2xf32, #tpu.memory_space<vmem>>, %arg3: memref<32x1xf32, #tpu.memory_space<vmem>>, %arg4: memref<32x32xf32, #tpu.memory_space<vmem>>, %arg5: memref<32x1xf32, #tpu.memory_space<vmem>>, %arg6: memref<1x32xf32, #tpu.memory_space<vmem>>, %arg7: memref<1x1xf32, #tpu.memory_space<vmem>>, %arg8: memref<1x128xf32, #tpu.memory_space<vmem>>) attributes {dimension_semantics = [#tpu.dimension_semantics<parallel>], iteration_bounds = array<i64: 3>, scalar_prefetch = 0 : i64, scratch_operands = 0 : i64, tpu.core_type = #tpu.core_type<tc>, window_params = [{transform_indices = @transform_0, window_bounds = array<i64: 2, 128>}, {pipeline_mode = #tpu.pipeline_mode<synchronous>, transform_indices = @transform_1, window_bounds = array<i64: 32, 2>}, {pipeline_mode = #tpu.pipeline_mode<synchronous>, transform_indices = @transform_2, window_bounds = array<i64: 32, 1>}, {pipeline_mode = #tpu.pipeline_mode<synchronous>, transform_indices = @transform_3, window_bounds = array<i64: 32, 32>}, {pipeline_mode = #tpu.pipeline_mode<synchronous>, transform_indices = @transform_4, window_bounds = array<i64: 32, 1>}, {pipeline_mode = #tpu.pipeline_mode<synchronous>, transform_indices = @transform_5, window_bounds = array<i64: 1, 32>}, {pipeline_mode = #tpu.pipeline_mode<synchronous>, transform_indices = @transform_6, window_bounds = array<i64: 1, 1>}, {transform_indices = @transform_7, window_bounds = array<i64: 1, 128>}]} {
    %c0 = arith.constant 0 : index
    %c0_0 = arith.constant 0 : index
    %0 = vector.load %arg1[%c0, %c0_0] : memref<2x128xf32, #tpu.memory_space<vmem>>, vector<1x128xf32>
    %c1 = arith.constant 1 : index
    %c0_1 = arith.constant 0 : index
    %1 = vector.load %arg1[%c1, %c0_1] : memref<2x128xf32, #tpu.memory_space<vmem>>, vector<1x128xf32>
    %c0_2 = arith.constant 0 : index
    %c0_3 = arith.constant 0 : index
    %2 = vector.load %arg2[%c0_2, %c0_3] : memref<32x2xf32, #tpu.memory_space<vmem>>, vector<32x1xf32>
    %3 = vector.broadcast %2 : vector<32x1xf32> to vector<32x128xf32>
    %4 = vector.broadcast %0 : vector<1x128xf32> to vector<32x128xf32>
    %5 = arith.mulf %3, %4 : vector<32x128xf32>
    %c0_4 = arith.constant 0 : index
    %c1_5 = arith.constant 1 : index
    %6 = vector.load %arg2[%c0_4, %c1_5] : memref<32x2xf32, #tpu.memory_space<vmem>>, vector<32x1xf32>
    %7 = vector.broadcast %6 : vector<32x1xf32> to vector<32x128xf32>
    %8 = vector.broadcast %1 : vector<1x128xf32> to vector<32x128xf32>
    %9 = arith.mulf %7, %8 : vector<32x128xf32>
    %10 = arith.addf %5, %9 : vector<32x128xf32>
    %c0_6 = arith.constant 0 : index
    %c0_7 = arith.constant 0 : index
    %11 = vector.load %arg3[%c0_6, %c0_7] : memref<32x1xf32, #tpu.memory_space<vmem>>, vector<32x1xf32>
    %12 = vector.broadcast %11 : vector<32x1xf32> to vector<32x128xf32>
    %13 = arith.addf %10, %12 : vector<32x128xf32>
    %14 = math.tanh %13 : vector<32x128xf32>
    %c0_8 = arith.constant 0 : index
    %c0_9 = arith.constant 0 : index
    %15 = vector.load %arg4[%c0_8, %c0_9] : memref<32x32xf32, #tpu.memory_space<vmem>>, vector<32x32xf32>
    %cst = arith.constant dense<0.000000e+00> : vector<32x128xf32>
    %16 = tpu.matmul %15, %14, %cst {dimension_numbers = #tpu.dot_dimension_numbers<[1], [0], [0], [1], [0, 0, 1, 1], [], []>} : vector<32x32xf32>, vector<32x128xf32>, vector<32x128xf32> -> vector<32x128xf32>
    %c0_10 = arith.constant 0 : index
    %c0_11 = arith.constant 0 : index
    %17 = vector.load %arg5[%c0_10, %c0_11] : memref<32x1xf32, #tpu.memory_space<vmem>>, vector<32x1xf32>
    %18 = vector.broadcast %17 : vector<32x1xf32> to vector<32x128xf32>
    %19 = arith.addf %16, %18 : vector<32x128xf32>
    %20 = math.tanh %19 : vector<32x128xf32>
    %c0_12 = arith.constant 0 : index
    %c0_13 = arith.constant 0 : index
    %21 = vector.load %arg6[%c0_12, %c0_13] : memref<1x32xf32, #tpu.memory_space<vmem>>, vector<1x32xf32>
    %cst_14 = arith.constant dense<0.000000e+00> : vector<1x128xf32>
    %22 = tpu.matmul %21, %20, %cst_14 {dimension_numbers = #tpu.dot_dimension_numbers<[1], [0], [0], [1], [0, 0, 1, 1], [], []>} : vector<1x32xf32>, vector<32x128xf32>, vector<1x128xf32> -> vector<1x128xf32>
    %c0_15 = arith.constant 0 : index
    %c0_16 = arith.constant 0 : index
    %23 = vector.load %arg7[%c0_15, %c0_16] : memref<1x1xf32, #tpu.memory_space<vmem>>, vector<1x1xf32>
    %24 = vector.broadcast %23 : vector<1x1xf32> to vector<1x128xf32>
    %25 = arith.addf %22, %24 : vector<1x128xf32>
    %26 = arith.negf %25 : vector<1x128xf32>
    %27 = math.exp %26 : vector<1x128xf32>
    %cst_17 = arith.constant 1.000000e+00 : f32
    %28 = vector.broadcast %cst_17 : f32 to vector<1x128xf32>
    %29 = arith.addf %28, %27 : vector<1x128xf32>
    %30 = arith.divf %28, %29 : vector<1x128xf32>
    %c0_18 = arith.constant 0 : index
    %c0_19 = arith.constant 0 : index
    %31 = vector.load %arg8[%c0_18, %c0_19] : memref<1x128xf32, #tpu.memory_space<vmem>>, vector<1x128xf32>
    tpu.vector_store %arg8[%c0_18, %c0_19], %30 {strides = array<i32>} : memref<1x128xf32, #tpu.memory_space<vmem>>, vector<1x128xf32>,
    return
  }
  func.func @transform_0(%arg0: i32) -> (i32, i32) {
    %c0_i32 = arith.constant 0 : i32
    %c0_i32_0 = arith.constant 0 : i32
    return %c0_i32, %arg0 : i32, i32
  }
  func.func @transform_1(%arg0: i32) -> (i32, i32) {
    %c0_i32 = arith.constant 0 : i32
    %c0_i32_0 = arith.constant 0 : i32
    %c0_i32_1 = arith.constant 0 : i32
    return %c0_i32, %c0_i32_0 : i32, i32
  }
  func.func @transform_2(%arg0: i32) -> (i32, i32) {
    %c0_i32 = arith.constant 0 : i32
    %c0_i32_0 = arith.constant 0 : i32
    %c0_i32_1 = arith.constant 0 : i32
    return %c0_i32, %c0_i32_0 : i32, i32
  }
  func.func @transform_3(%arg0: i32) -> (i32, i32) {
    %c0_i32 = arith.constant 0 : i32
    %c0_i32_0 = arith.constant 0 : i32
    %c0_i32_1 = arith.constant 0 : i32
    return %c0_i32, %c0_i32_0 : i32, i32
  }
  func.func @transform_4(%arg0: i32) -> (i32, i32) {
    %c0_i32 = arith.constant 0 : i32
    %c0_i32_0 = arith.constant 0 : i32
    %c0_i32_1 = arith.constant 0 : i32
    return %c0_i32, %c0_i32_0 : i32, i32
  }
  func.func @transform_5(%arg0: i32) -> (i32, i32) {
    %c0_i32 = arith.constant 0 : i32
    %c0_i32_0 = arith.constant 0 : i32
    %c0_i32_1 = arith.constant 0 : i32
    return %c0_i32, %c0_i32_0 : i32, i32
  }
  func.func @transform_6(%arg0: i32) -> (i32, i32) {
    %c0_i32 = arith.constant 0 : i32
    %c0_i32_0 = arith.constant 0 : i32
    %c0_i32_1 = arith.constant 0 : i32
    return %c0_i32, %c0_i32_0 : i32, i32
  }
  func.func @transform_7(%arg0: i32) -> (i32, i32) {
    %c0_i32 = arith.constant 0 : i32
    %c0_i32_0 = arith.constant 0 : i32
    return %c0_i32, %arg0 : i32, i32
  }
}

</mosaic_0001>

<bundles_post_ra>
// kernel: tpu_custom_call.1
= control target key start
LH: loop header
LB: loop body
LE: loop exit
PB: predicated region body
PF: predicated region fallthrough
CT: control target
= control target key end

     0   :  { %s1065_s0 = inlined_call_operand.vmem [shape: f32[2,384], index: 0, kind: input, shape index: {}]   ;;  %s1066_s1 = inlined_call_operand.vmem [shape: f32[32,2], index: 1, kind: input, shape index: {}]   ;;  %s1067_s2 = inlined_call_operand.vmem [shape: f32[32,1], index: 2, kind: input, shape index: {}]   ;;  %s1068_s3 = inlined_call_operand.vmem [shape: f32[32,32], index: 3, kind: input, shape index: {}]   ;;  %s1069_s4 = inlined_call_operand.vmem [shape: f32[32,1], index: 4, kind: input, shape index: {}]   ;;  %s1070_s5 = inlined_call_operand.vmem [shape: f32[1,32], index: 5, kind: input, shape index: {}]   ;;  %s1071_s6 = inlined_call_operand.<no memory space> [shape: f32[1,1], index: 6, kind: input, shape index: {}]   ;;  %s1072_s7 = inlined_call_operand.hbm [shape: f32[1,384], index: 7, kind: output, shape index: {}]  }
   0x1   :  { %v12_v0 = vstv %s1071_s6 }
   0x2   :  { %13 = vst [vmem:[#allocation2] sm:$0x1] %v12_v0 }
   0x3   :  { %14 = vsyncpa [#allocation4], 0 }
   0x4   :  { %16 = vsyncpa [#allocation4 + $0x1], 0  ;;  %s909_s26 = smov 0   ;;  %s911_s27 = smov 0  }
   0x5   :  { %s913_s28 = smov 0   ;;  %s915_s29 = smov 0  }
   0x6 LB: > { %s930_s6 = sadd.s32 4294967295, %s858_s29   ;;  %s658_s30 = sadd.s32 4294967294, %s858_s29   ;;  %s858_s29 = sphi %s915_s29, %s1078_s29   ;;  %s854_s28 = sphi %s913_s28, %s1077_s28   ;;  %s850_s27 = sphi %s911_s27, %s1076_s27   ;;  %s846_s26 = sphi %s909_s26, %s1075_s26  }
   0x7   : > { %s934_s8 = sadd.s32 1, %s858_s29   ;;  %s181_s9 = sadd.s32 1, %s854_s28 }
   0x8   : > { %s178_s10 = ssub.s32 %s858_s29, %s934_s8  ;;  %p191_p0 = scmp.ne.s32.totalorder %s854_s28, %s850_s27 }
   0x9   : > { %p179_p1 = scmp.eq.s32.totalorder %s178_s10, 0  ;;  %p192_p2 = scmp.eq.s32.totalorder %s930_s6, 2 }
   0xa   : > { %p197_p3 = scmp.ne.s32.totalorder %s850_s27, %s846_s26  ;;  %p198_p4 = scmp.eq.s32.totalorder %s658_s30, 2 }
   0xb   : > { %s945_s11 = scalar_select %p179_p1, %s854_s28, %s181_s9  }
   0xc   : > { %p947_p5 = por %p192_p2, %p191_p0  ;;  %p951_p6 = por %p198_p4, %p197_p3 }
   0xd   : > { %p661_p7 = scmp.ge.s32.totalorder %s858_s29, 1  ;;  %p241_p8 = scmp.lt.s32.totalorder %s858_s29, 4 }
   0xf   : > { %p242_p9 = pnand %p661_p7, %p241_p8 }
  0x10   : > { %v279_v1 = vld [vmem:[%s1066_s1 + $0x10] sm:$0xff] (!%p242_p9)  ;;  %v277_v2 = vld [vmem:[%s1066_s1] sm:$0xff] (!%p242_p9)  ;;  %v860_v3 = vmov (!%p242_p9), 1   ;;  %v278_v4 = vld [vmem:[%s1066_s1 + $0x8] sm:$0xff] (!%p242_p9)  ;;  %v861_v5 = vmov (!%p242_p9), 0   ;;  %vm397_vm0 = vcmask (!%p242_p9), 261120  }
  0x11   : > { %245 = sbr.rel (%p242_p9) target bundleno = 681 (0x2a9), region = 48  ;;  %772 = vset.pattern.permute.xlu0 (!%p242_p9), %v860_v3  ;;  %770 = vset.pattern.permute.xlu1 (!%p242_p9), %v860_v3  ;;  %v280_v6 = vld [vmem:[%s1066_s1 + $0x18] sm:$0xff] (!%p242_p9)  ;;  %v338_v7 = vld [vmem:[%s1067_s2 + $0x8] sm:$0xff] (!%p242_p9)  ;;  %v337_v8 = vld [vmem:[%s1067_s2] sm:$0xff] (!%p242_p9)  ;;  %p271_p10 = scmp.lt.s32.totalorder (!%p242_p9), %s930_s6, 2  ;;  %v862_v56 = vmov (!%p242_p9), 0.0|0.0  }
  0x12   : > { %318 = vperm.xlu0 (!%p242_p9), %772, %v279_v1   ;;  %310 = vperm.xlu1 (!%p242_p9), %770, %v277_v2   ;;  %v373_v9 = vld [vmem:[%s1069_s4] sm:$0xff] (!%p242_p9)  ;;  %v339_v10 = vld [vmem:[%s1067_s2 + $0x10] sm:$0xff] (!%p242_p9)  ;;  %v340_v12 = vld [vmem:[%s1067_s2 + $0x18] sm:$0xff] (!%p242_p9)  ;;  %vm863_vm1 = vmmov (!%p242_p9), 0   ;;  %v864_v57 = vmov (!%p242_p9), 0.0   ;;  %s269_s23 = sand.u32 (!%p242_p9), 1, %s850_s27  }
  0x13   : > { %v375_v11 = vld [vmem:[%s1069_s4 + $0x10] sm:$0xff] (!%p242_p9)  ;;  %v500_v13 = vld [vmem:[#allocation2] sm:$0x1] (!%p242_p9)  ;;  %v374_v14 = vld [vmem:[%s1069_s4 + $0x8] sm:$0xff] (!%p242_p9)  ;;  %720 = vmatprep.subr.bf16.mxu1 (!%p242_p9), %v862_v56  ;;  %709 = vmatprep.mubr.msk.f32.mxu1 (!%p242_p9), %vm863_vm1, %v864_v57  ;;  %s671_s24 = sshll.u32 (!%p242_p9), %s930_s6, 4  ;;  %s591_s15 = scalar_lea.sflag (!%p242_p9), [#allocation4], %s269_s23 }
  0x14   : > { %v376_v15 = vld [vmem:[%s1069_s4 + $0x18] sm:$0xff] (!%p242_p9)  ;;  %v369_v16 = vld [vmem:[%s1068_s3] sm:$0xff] (!%p242_p9)  ;;  %v370_v53 = vld [vmem:[%s1068_s3 + $0x8] sm:$0xff] (!%p242_p9) }
  0x15   : > { %695 = vmatprep.mubr.msk.f32.mxu0 (!%p242_p9), %vm397_vm0, %v369_v16  ;;  %v371_v54 = vld [vmem:[%s1068_s3 + $0x10] sm:$0xff] (!%p242_p9)  ;;  %v372_v55 = vld [vmem:[%s1068_s3 + $0x18] sm:$0xff] (!%p242_p9) }
  0x16   : > { %773 = vset.pattern.permute.xlu0 (!%p242_p9), %v861_v5  ;;  %314 = vperm.xlu1 (!%p242_p9), %770, %v278_v4  }
  0x17   : > { %283 = vperm.xlu0 (!%p242_p9), %773, %v277_v2  }
  0x18   : > { %s272_s25 = scalar_select %p271_p10, %s930_s6, 2 }
  0x19   : > { %s865_s6 = smov [#allocation3]  }
  0x1a   : > { %771 = vset.pattern.permute.xlu1 %v861_v5  ;;  %s662_s30 = sshll.u32 %s272_s25, 1  ;;  %s270_s25 = scalar_lea.vmem [#allocation3], %s269_s23 }
  0x1b   : > { %288 = vperm.xlu0 %773, %v278_v4   ;;  %298 = vperm.xlu1 %771, %v280_v6   ;;  %s274_s14 = scalar_lea.vmem %s1065_s0, %s662_s30  ;;  %s603_s30 = sshll.u32 %s270_s25, 4  ;;  %s1025_s30 = int_to_ptr.vmem [resolvable:$true] %s603_s30 }
  0x1c   : > { %v663_v23 = vld [vmem:[%s274_s14] ss:$0 sm:$0xff]  ;;  %v664_v25 = vld [vmem:[%s274_s14 + $0x1] ss:$0 sm:$0xff]  ;;  %s1023_s14 = scalar_lea.hbm %s1072_s7, %s671_s24  ;;  %s796_s16 = scalar_lea.vmem %s1025_s30, 16 }
  0x1d   : > { %p797_p11 = scmp.ne.s32.totalorder %s1025_s30, %s796_s16  ;;  %s800_s17 = sshll.u32 %s865_s6, 4  ;;  %s801_s17 = int_to_ptr.vmem [resolvable:$false] %s800_s17 }
  0x1e   : > { %s802_s18 = scalar_lea.vmem %s801_s17, 32  ;;  %p803_p0 = scmp.lt.s32.totalorder %s1025_s30, %s801_s17 }
  0x1f   : > { %293 = vperm.xlu0 %773, %v279_v1   ;;  %774 = vset.pattern.permute.xlu1 %v860_v3  ;;  %p798_p12 = pnand %p797_p11, %p947_p5  ;;  %p804_p1 = scmp.lt.s32.totalorder %s802_s18, %s796_s16 }
  0x20   : > { %322 = vperm.xlu1 %774, %v280_v6  }
  0x21   : > { %p799_p13 = pneg %p798_p12  ;;  %p805_p2 = por %p804_p1, %p803_p0 }
  0x23   : > { %348 = vperm.xlu0 %773, %v338_v7   ;;  %p806_p3 = pnand %p805_p2, %p799_p13 }
  0x24   : > { %775 = vset.pattern.permute.xlu1 %v861_v5 }
  0x25   : > { %343 = vperm.xlu1 %775, %v337_v8  }
  0x27   : > { %379 = vperm.xlu0 %773, %v373_v9  }
  0x29   : > { %353 = vperm.xlu1 %775, %v339_v10  }
  0x2b   : > { %389 = vperm.xlu0 %773, %v375_v11  }
  0x2d   : > { %358 = vperm.xlu1 %775, %v340_v12   ;;  %v499_v12 = vld [vmem:[%s1070_s5] sm:$0x1] }
  0x2f   : > { %503 = vperm.xlu0 %773, %v500_v13   ;;  %v506_v13 = vlaneseq }
  0x31   : > { %384 = vperm.xlu1 %775, %v374_v14   ;;  %v507_v14 = vshrl.u32 %v506_v13, 7 }
  0x35   : > { %394 = vperm.xlu1 %775, %v376_v15   ;;  %v508_v15 = vsub.s32 0, %v507_v14 }
  0x91   : > { %v311_v17 = vpop.permute.xlu1 %310  ;;  %v319_v18 = vpop.permute.xlu0 %318 }
  0x92   : > { %v329_v30 = vmul.f32 %v664_v25, %v311_v17  ;;  %v331_v38 = vmul.f32 %v664_v25, %v319_v18 }
  0x95   : > { %v315_v19 = vpop.permute.xlu1 %314 }
  0x96   : > { %v284_v20 = vpop.permute.xlu0 %283  ;;  %v330_v27 = vmul.f32 %v664_v25, %v315_v19 }
  0x97   : > { %v305_v28 = vmul.f32 %v663_v23, %v284_v20 }
  0x99   : > { %v333_v34 = vadd.f32 %v329_v30, %v305_v28 }
  0x9a   : > { %v289_v21 = vpop.permute.xlu0 %288  ;;  %v299_v22 = vpop.permute.xlu1 %298 }
  0x9b   : > { %v306_v24 = vmul.f32 %v663_v23, %v289_v21  ;;  %v308_v42 = vmul.f32 %v663_v23, %v299_v22 }
  0x9d   : > { %v334_v31 = vadd.f32 %v330_v27, %v306_v24 }
  0x9e   : > { %v294_v26 = vpop.permute.xlu0 %293 }
  0x9f   : > { %v323_v29 = vpop.permute.xlu1 %322  ;;  %v307_v35 = vmul.f32 %v663_v23, %v294_v26 }
  0xa0   : > { %v332_v39 = vmul.f32 %v664_v25, %v323_v29 }
  0xa1   : > { %v335_v41 = vadd.f32 %v331_v38, %v307_v35 }
  0xa2   : > { %v349_v32 = vpop.permute.xlu0 %348  ;;  %v336_v44 = vadd.f32 %v332_v39, %v308_v42 }
  0xa3   : > { %v362_v33 = vadd.f32 %v349_v32, %v334_v31 }
  0xa4   : > { %v344_v36 = vpop.permute.xlu1 %343 }
  0xa5   : > { %v361_v37 = vadd.f32 %v344_v36, %v333_v34  ;;  %776 = vtanh.f32 %v362_v33 }
  0xa6   : > { %v380_v59 = vpop.permute.xlu0 %379 }
  0xa7   : > { %778 = vtanh.f32 %v361_v37 }
  0xa8   : > { %v354_v40 = vpop.permute.xlu1 %353 }
  0xa9   : > { %v363_v43 = vadd.f32 %v354_v40, %v335_v41 }
  0xaa   : > { %v390_v2 = vpop.permute.xlu0 %389 }
  0xab   : > { %780 = vtanh.f32 %v363_v43 }
  0xac   : > { %v359_v45 = vpop.permute.xlu1 %358 }
  0xad   : > { %v364_v46 = vadd.f32 %v359_v45, %v336_v44 }
  0xae   : > { %v504_v16 = vpop.permute.xlu0 %503 }
  0xaf   : > { %782 = vtanh.f32 %v364_v46  ;;  %v777_v47 = vpop.eup %776  ;;  %v509_v17 = vrot.slane %v504_v16, %v508_v15 }
  0xb0   : > { %v385_v58 = vpop.permute.xlu1 %384 }
  0xb1   : > { %v779_v48 = vpop.eup %778 }
  0xb2   : > { %v712_v49 = vpack.c.bf16 %v777_v47, %v779_v48 }
  0xb4   : > { %713 = vmatprep.subr.bf16.mxu0 %v712_v49  ;;  %v395_v0 = vpop.permute.xlu1 %394 }
  0xb5   : > { %715 = vmatpush3.bf16.msra.mxu0 %v712_v49  ;;  %v781_v50 = vpop.eup %780 }
  0xb9   : > { %v783_v51 = vpop.eup %782 }
  0xba   : > { %v716_v52 = vpack.c.bf16 %v783_v51, %v781_v50 }
  0xbc   : > { %717 = vmatprep.subr.bf16.mxu0 %v716_v52 }
  0xbd   : > { %719 = vmatpush3.bf16.msra.mxu0 %v716_v52 }
  0xc0   : > { %696 = vmatmul.mubr.msk.f32.vlgmr.msra.gmra.mrb[0].mxu0 %vm397_vm0, %v370_v53 }
  0xc1   : > { %698 = vmatprep.mubr.msk.f32.mxu0 %vm397_vm0, %v371_v54 }
  0xc4   : > { %699 = vmatmul.mubr.msk.f32.gmra.mrb[2].mxu0 %vm397_vm0, %v372_v55 }
 0x193   : > { %v697_v60 = vpop.f32.mrb[0].mxu0 }
 0x194   : > { %v482_v61 = vadd.f32 %v697_v60, %v385_v58  ;;  %v476_v62 = vpop.f32.mrb[1].mxu0 }
 0x195   : > { %v477_v63 = vadd.f32 %v476_v62, %v380_v59 }
 0x196   : > { %784 = vtanh.f32 %v482_v61 }
 0x197   : > { %786 = vtanh.f32 %v477_v63  ;;  %v700_v1 = vpop.f32.mrb[2].mxu0 }
 0x198   : > { %v492_v3 = vadd.f32 %v700_v1, %v395_v0  ;;  %v486_v4 = vpop.f32.mrb[3].mxu0 }
 0x199   : > { %v487_v5 = vadd.f32 %v486_v4, %v390_v2 }
 0x19a   : > { %788 = vtanh.f32 %v492_v3 }
 0x19b   : > { %790 = vtanh.f32 %v487_v5 }
 0x1a0   : > { %v785_v6 = vpop.eup %784 }
 0x1a1   : > { %v787_v7 = vpop.eup %786 }
 0x1a2   : > { %v721_v8 = vpack.c.bf16 %v785_v6, %v787_v7 }
 0x1a4   : > { %v789_v9 = vpop.eup %788  ;;  %722 = vmatpush3.bf16.msra.mxu1 %v721_v8 }
 0x1a5   : > { %v791_v10 = vpop.eup %790  ;;  %723 = vmatprep.subr.bf16.mxu1 %v862_v56 }
 0x1a6   : > { %v724_v11 = vpack.c.bf16 %v789_v9, %v791_v10 }
 0x1a8   : > { %725 = vmatpush3.bf16.msra.mxu1 %v724_v11 }
 0x1ab   : > { %710 = vmatmul.mubr.msk.f32.vlgmr.msra.gmra.mrb[0].mxu1 %vm397_vm0, %v499_v12 }
 0x27e   : > { %v579_v18 = vpop.f32.mrb[0].mxu1 }
 0x27f   : > { %v580_v19 = vadd.f32 %v579_v18, %v509_v17  ;;  %v711_v20 = vpop.f32.mrb[1].mxu1 }
 0x281   : > { %v670_v21 = vmul.f32 -1.442695, %v580_v19 }
 0x283   : > { %792 = vpow2.f32 %v670_v21 }
 0x28d   : > { %v793_v22 = vpop.eup %792 }
 0x28e   : > { %v586_v23 = vadd.f32 1.0, %v793_v22 }
 0x290   : > { %794 = vrcp.f32 %v586_v23 }
 0x29a   : > { %v795_v24 = vpop.eup %794 }
 0x29b   : > { %589 = vst [vmem:[%s270_s25] sm:$0x1] %v795_v24 }
 0x29c   : > { %809 = shalt.err (!%p806_p3)
}
 0x29d   : > { %s810_s19 = scalar_lea.hbm %s1023_s14, 16  ;;  %s814_s22 = scalar_lea.hbm %s1072_s7, 48 }
 0x29e   : > { %p811_p4 = scmp.ne.s32.totalorder %s1023_s14, %s810_s19  ;;  %p815_p9 = scmp.lt.u32.totalorder %s1023_s14, %s1072_s7 }
 0x29f   : > { %p816_p10 = scmp.lt.u32.totalorder %s814_s22, %s810_s19  ;;  %p818_p12 = scmp.lt.u32.totalorder %s810_s19, %s1023_s14 }
 0x2a0   : > { %p812_p7 = pnand %p811_p4, %p947_p5 }
 0x2a1   : > { %p817_p11 = por %p816_p10, %p815_p9 }
 0x2a2   : > { %p813_p8 = pneg %p812_p7 }
 0x2a3   : > { %p819_p13 = por %p818_p12, %p817_p11 }
 0x2a5   : > { %p820_p0 = pnand %p819_p13, %p813_p8 }
 0x2a7   : > { %823 = shalt.err (!%p820_p0)
}
 0x2a8   : > { %726 = dma.vmem_to_hbm [thread:$0]  (%p947_p5), %s1025_s30, 16, %s1023_s14, %s591_s15  }
 0x2a9 PF: > { %p732_p1 = scmp.ge.s32.totalorder %s858_s29, 2  ;;  %s615_s25 = sand.u32 1, %s846_s26  }
 0x2aa   : > { %s616_s9 = scalar_lea.sflag [#allocation4], %s615_s25 }
 0x2ab   : > { %p729_p2 = pnand %p732_p1, %p951_p6 }
 0x2ad   : > { %841 = dma.done.wait (!%p729_p2), %s616_s9, 16  }
 0x2ae   : > { %843 = vsyncadd (!%p729_p2), %s616_s9, 4294967280  ;;  %p19_p3 = scmp.ge.s32.totalorder %s934_s8, 5   ;;  %s1075_s26 = smov %s850_s27 }
 0x2af   : > { %s1076_s27 = smov %s854_s28  ;;  %s1077_s28 = smov %s945_s11 }
 0x2b0   : > { %s1078_s29 = smov %s934_s8  ;;  %21 = sbr.rel (!%p19_p3) target bundleno = 6 (0x6), region = 83 }
 0x2b7   :  { %620 = vsyncpa [#allocation4], 1 }
 0x2b8   :  { %622 = vsyncpa [#allocation4 + $0x1], 1 }

</bundles_post_ra>
